<compile_context>
chip_gen: v7x
topology: tpu7x:2x2x1
jax: 0.10.0
libtpu: 0.0.40
codegen_flags: <defaults>
</compile_context>

<pallas_src>
import jax
import jax.numpy as jnp
from jax.experimental import pallas as pl
from jax.experimental.pallas import tpu as pltpu


def _round_up(a: int, b: int) -> int:
    return (a + b - 1) // b * b


def ffn_kernel(x_ref, w1_ref, b1_ref, w2_ref, b2_ref, o_ref, acc_ref):
    # x_ref:  (tm, dmp)       bf16 (or compute dtype)
    # w1_ref: (dmp, tff)      bf16
    # b1_ref: (1, tff)        f32
    # w2_ref: (tff, dmp)      bf16
    # b2_ref: (1, dmp)        f32
    # o_ref:  (tm, dmp)       out dtype
    # acc_ref:(tm, dmp)       f32 accumulator (resident across the k axis)
    k = pl.program_id(1)

    @pl.when(k == 0)
    def _():
        acc_ref[...] = jnp.zeros_like(acc_ref)

    # First matmul chunk + bias + ReLU, all in f32.
    h = jnp.dot(x_ref[...], w1_ref[...], preferred_element_type=jnp.float32)
    h = jnp.maximum(h + b1_ref[...], 0.0)
    # TODO(synk): dropout is identity here (inference mode); training-mode
    # dropout would use pltpu.prng_seed + pltpu.prng_random_bits masking of h.

    # Second matmul chunk, accumulate in f32.
    acc_ref[...] += jnp.dot(h.astype(w2_ref.dtype), w2_ref[...],
                            preferred_element_type=jnp.float32)

    @pl.when(k == pl.num_programs(1) - 1)
    def _():
        o_ref[...] = (acc_ref[...] + b2_ref[...]).astype(o_ref.dtype)


def feed_forward_block(x, w1, b1, w2, b2, *, tile_rows=256, tile_ff=512,
                       use_bf16=True):
    """x: (batch, seq, d_model). w1: (d_model, d_ff), w2: (d_ff, d_model)."""
    batch, seq, d_model = x.shape
    d_ff = w1.shape[1]
    rows = batch * seq
    out_dtype = x.dtype

    # --- row tiling: MXU-aligned when large, shrink (to a multiple of 8) and
    # pad for small / ragged row counts instead of asserting divisibility.
    tm = min(tile_rows, _round_up(rows, 8))
    padded_rows = _round_up(rows, tm)

    # --- d_model padding to a lane-dense multiple of 128 when ragged.  Zero
    # columns of x / zero rows of w1 / zero columns of w2 & b2 are exact no-ops.
    dmp = _round_up(d_model, 128)

    # --- d_ff tiling (reduction axis).  If d_ff fits in one tile, use the full
    # dim; otherwise tile_ff must be a multiple of 128 and d_ff is zero-padded
    # up to a multiple of it (ReLU(0 + 0) = 0 and 0 @ w2 = 0, so exact).
    if d_ff <= tile_ff:
        tff = d_ff
        padded_ff = d_ff
    else:
        assert tile_ff % 128 == 0, "tile_ff must be a multiple of 128"
        tff = tile_ff
        padded_ff = _round_up(d_ff, tff)

    compute_dtype = jnp.bfloat16 if use_bf16 else x.dtype

    # Activations.
    x2 = x.reshape(rows, d_model)
    if padded_rows != rows or dmp != d_model:
        x2 = jnp.pad(x2, ((0, padded_rows - rows), (0, dmp - d_model)))
    x2 = x2.astype(compute_dtype)

    # Weights / biases (padded once; for real transformer sizes this is a no-op).
    w1c = w1.astype(compute_dtype)
    w2c = w2.astype(compute_dtype)
    b1p, b2p = b1, b2
    if dmp != d_model or padded_ff != d_ff:
        w1c = jnp.pad(w1c, ((0, dmp - d_model), (0, padded_ff - d_ff)))
        w2c = jnp.pad(w2c, ((0, padded_ff - d_ff), (0, dmp - d_model)))
        b1p = jnp.pad(b1, (0, padded_ff - d_ff))
        b2p = jnp.pad(b2, (0, dmp - d_model))
    b1_2 = b1p.reshape(1, padded_ff).astype(jnp.float32)
    b2_2 = b2p.reshape(1, dmp).astype(jnp.float32)

    grid = (padded_rows // tm, padded_ff // tff)

    # Advisory cost estimate so XLA schedules around the custom call sensibly.
    itemsize = jnp.dtype(compute_dtype).itemsize
    flops = 2 * padded_rows * dmp * padded_ff * 2
    bytes_accessed = (
        padded_rows * dmp * itemsize                 # x
        + 2 * dmp * padded_ff * itemsize             # w1 + w2
        + (padded_ff + dmp) * 4                      # biases (f32)
        + padded_rows * dmp * jnp.dtype(out_dtype).itemsize  # out
    )
    cost = pl.CostEstimate(flops=flops, transcendentals=0,
                           bytes_accessed=bytes_accessed)

    out2 = pl.pallas_call(
        ffn_kernel,
        out_shape=jax.ShapeDtypeStruct((padded_rows, dmp), out_dtype),
        grid_spec=pltpu.PrefetchScalarGridSpec(
            num_scalar_prefetch=0,
            grid=grid,
            in_specs=[
                pl.BlockSpec((tm, dmp), lambda i, k: (i, 0)),
                pl.BlockSpec((dmp, tff), lambda i, k: (0, k)),
                pl.BlockSpec((1, tff), lambda i, k: (0, k)),
                pl.BlockSpec((tff, dmp), lambda i, k: (k, 0)),
                pl.BlockSpec((1, dmp), lambda i, k: (0, 0)),
            ],
            out_specs=pl.BlockSpec((tm, dmp), lambda i, k: (i, 0)),
            scratch_shapes=[pltpu.VMEM((tm, dmp), jnp.float32)],
        ),
        compiler_params=pltpu.CompilerParams(
            # rows axis parallel (megacore sharding), d_ff reduction axis
            # arbitrary (accumulator pattern).
            dimension_semantics=("parallel", "arbitrary"),
            vmem_limit_bytes=64 * 1024 * 1024,
        ),
        cost_estimate=cost,
    )(x2, w1c, b1_2, w2c, b2_2)

    return out2[:rows, :d_model].reshape(batch, seq, d_model)


def reference_ffn(x, w1, b1, w2, b2):
    h = jnp.maximum(jnp.einsum("bsd,df->bsf", x, w1) + b1, 0.0)
    return jnp.einsum("bsf,fd->bsd", h, w2) + b2


def _make_params(key, d_model, d_ff):
    k1, k2, k3, k4 = jax.random.split(key, 4)
    # PyTorch nn.Linear stores weight as (out, in); we build (in, out) directly
    # (equivalent to weight.T) with deterministic init.
    lim1 = 1.0 / jnp.sqrt(d_model)
    lim2 = 1.0 / jnp.sqrt(d_ff)
    w1 = jax.random.uniform(k1, (d_model, d_ff), jnp.float32, -lim1, lim1)
    b1 = jax.random.uniform(k2, (d_ff,), jnp.float32, -lim1, lim1)
    w2 = jax.random.uniform(k3, (d_ff, d_model), jnp.float32, -lim2, lim2)
    b2 = jax.random.uniform(k4, (d_model,), jnp.float32, -lim2, lim2)
    return w1, b1, w2, b2


if __name__ == "__main__":
    key = jax.random.PRNGKey(0)
    kx1, kp1, kx2, kp2 = jax.random.split(key, 4)

    # --- case 1: small, deterministic config (single d_ff tile path).
    batch, seq, d_model, d_ff = 2, 8, 32, 64
    x = jax.random.normal(kx1, (batch, seq, d_model), dtype=jnp.float32)
    w1, b1, w2, b2 = _make_params(kp1, d_model, d_ff)

    out = feed_forward_block(x, w1, b1, w2, b2)
    out = jax.block_until_ready(out)
    ref = reference_ffn(x, w1, b1, w2, b2)
    assert out.shape == (batch, seq, d_model)
    # bf16 MXU operands with f32 accumulation -> looser tolerance than pure f32.
    assert jnp.allclose(out, ref, atol=2e-2, rtol=2e-2), "mismatch (case 1)"

    # --- case 2: ragged dims, multi-step d_ff reduction (exercises padding +
    # accumulator path with small tile overrides).
    batch, seq, d_model, d_ff = 1, 13, 48, 200
    x = jax.random.normal(kx2, (batch, seq, d_model), dtype=jnp.float32)
    w1, b1, w2, b2 = _make_params(kp2, d_model, d_ff)

    out = feed_forward_block(x, w1, b1, w2, b2, tile_rows=8, tile_ff=128)
    out = jax.block_until_ready(out)
    ref = reference_ffn(x, w1, b1, w2, b2)
    assert out.shape == (batch, seq, d_model)
    assert jnp.allclose(out, ref, atol=2e-2, rtol=2e-2), "mismatch (case 2)"

    print("KERNEL_OK")
</pallas_src>

<mosaic_0001>
module attributes {stable_mosaic.version = 11 : i64} {
  func.func @ffn_kernel(%arg0: i32, %arg1: i32, %arg2: memref<16x128xbf16, #tpu.memory_space<vmem>>, %arg3: memref<128x64xbf16, #tpu.memory_space<vmem>>, %arg4: memref<1x64xf32, #tpu.memory_space<vmem>>, %arg5: memref<64x128xbf16, #tpu.memory_space<vmem>>, %arg6: memref<1x128xf32, #tpu.memory_space<vmem>>, %arg7: memref<16x128xf32, #tpu.memory_space<vmem>>, %arg8: memref<16x128xf32, #tpu.memory_space<vmem>>) attributes {dimension_semantics = [#tpu.dimension_semantics<parallel>, #tpu.dimension_semantics<arbitrary>], iteration_bounds = array<i64: 1, 1>, scalar_prefetch = 0 : i64, scratch_operands = 1 : i64, tpu.core_type = #tpu.core_type<tc>, window_params = [{transform_indices = @transform_0, window_bounds = array<i64: 16, 128>}, {transform_indices = @transform_1, window_bounds = array<i64: 128, 64>}, {transform_indices = @transform_2, window_bounds = array<i64: 1, 64>}, {transform_indices = @transform_3, window_bounds = array<i64: 64, 128>}, {pipeline_mode = #tpu.pipeline_mode<synchronous>, transform_indices = @transform_4, window_bounds = array<i64: 1, 128>}, {transform_indices = @transform_5, window_bounds = array<i64: 16, 128>}]} {
    %c0_i32 = arith.constant 0 : i32
    %0 = arith.cmpi eq, %arg1, %c0_i32 : i32
    %1 = arith.extui %0 : i1 to i32
    %c0_i32_0 = arith.constant 0 : i32
    %2 = arith.cmpi ne, %1, %c0_i32_0 : i32
    scf.if %2 {
      %cst_16 = arith.constant 0.000000e+00 : f32
      %20 = vector.broadcast %cst_16 : f32 to vector<16x128xf32>
      %c0_17 = arith.constant 0 : index
      %c0_18 = arith.constant 0 : index
      %21 = vector.load %arg8[%c0_17, %c0_18] : memref<16x128xf32, #tpu.memory_space<vmem>>, vector<16x128xf32>
      tpu.vector_store %arg8[%c0_17, %c0_18], %20 {strides = array<i32>} : memref<16x128xf32, #tpu.memory_space<vmem>>, vector<16x128xf32>,
    } else {
    }
    %c0 = arith.constant 0 : index
    %c0_1 = arith.constant 0 : index
    %3 = vector.load %arg2[%c0, %c0_1] : memref<16x128xbf16, #tpu.memory_space<vmem>>, vector<16x128xbf16>
    %c0_2 = arith.constant 0 : index
    %c0_3 = arith.constant 0 : index
    %4 = vector.load %arg3[%c0_2, %c0_3] : memref<128x64xbf16, #tpu.memory_space<vmem>>, vector<128x64xbf16>
    %cst = arith.constant dense<0.000000e+00> : vector<16x64xf32>
    %5 = tpu.matmul %3, %4, %cst {dimension_numbers = #tpu.dot_dimension_numbers<[1], [0], [0], [1], [0, 0, 1, 1], [], []>} : vector<16x128xbf16>, vector<128x64xbf16>, vector<16x64xf32> -> vector<16x64xf32>
    %c0_4 = arith.constant 0 : index
    %c0_5 = arith.constant 0 : index
    %6 = vector.load %arg4[%c0_4, %c0_5] : memref<1x64xf32, #tpu.memory_space<vmem>>, vector<1x64xf32>
    %7 = vector.broadcast %6 : vector<1x64xf32> to vector<16x64xf32>
    %8 = arith.addf %5, %7 : vector<16x64xf32>
    %cst_6 = arith.constant 0.000000e+00 : f32
    %9 = vector.broadcast %cst_6 : f32 to vector<16x64xf32>
    %10 = arith.maximumf %8, %9 : vector<16x64xf32>
    %c0_7 = arith.constant 0 : index
    %c0_8 = arith.constant 0 : index
    %11 = vector.load %arg8[%c0_7, %c0_8] : memref<16x128xf32, #tpu.memory_space<vmem>>, vector<16x128xf32>
    %12 = arith.truncf %10 : vector<16x64xf32> to vector<16x64xbf16>
    %c0_9 = arith.constant 0 : index
    %c0_10 = arith.constant 0 : index
    %13 = vector.load %arg5[%c0_9, %c0_10] : memref<64x128xbf16, #tpu.memory_space<vmem>>, vector<64x128xbf16>
    %cst_11 = arith.constant dense<0.000000e+00> : vector<16x128xf32>
    %14 = tpu.matmul %12, %13, %cst_11 {dimension_numbers = #tpu.dot_dimension_numbers<[1], [0], [0], [1], [0, 0, 1, 1], [], []>} : vector<16x64xbf16>, vector<64x128xbf16>, vector<16x128xf32> -> vector<16x128xf32>
    %15 = arith.addf %11, %14 : vector<16x128xf32>
    %c0_12 = arith.constant 0 : index
    %c0_13 = arith.constant 0 : index
    %16 = vector.load %arg8[%c0_12, %c0_13] : memref<16x128xf32, #tpu.memory_space<vmem>>, vector<16x128xf32>
    tpu.vector_store %arg8[%c0_12, %c0_13], %15 {strides = array<i32>} : memref<16x128xf32, #tpu.memory_space<vmem>>, vector<16x128xf32>,
    %c0_i32_14 = arith.constant 0 : i32
    %17 = arith.cmpi eq, %arg1, %c0_i32_14 : i32
    %18 = arith.extui %17 : i1 to i32
    %c0_i32_15 = arith.constant 0 : i32
    %19 = arith.cmpi ne, %18, %c0_i32_15 : i32
    scf.if %19 {
      %c0_16 = arith.constant 0 : index
      %c0_17 = arith.constant 0 : index
      %20 = vector.load %arg8[%c0_16, %c0_17] : memref<16x128xf32, #tpu.memory_space<vmem>>, vector<16x128xf32>
      %c0_18 = arith.constant 0 : index
      %c0_19 = arith.constant 0 : index
      %21 = vector.load %arg6[%c0_18, %c0_19] : memref<1x128xf32, #tpu.memory_space<vmem>>, vector<1x128xf32>
      %22 = vector.broadcast %21 : vector<1x128xf32> to vector<16x128xf32>
      %23 = arith.addf %20, %22 : vector<16x128xf32>
      %c0_20 = arith.constant 0 : index
      %c0_21 = arith.constant 0 : index
      %24 = vector.load %arg7[%c0_20, %c0_21] : memref<16x128xf32, #tpu.memory_space<vmem>>, vector<16x128xf32>
      tpu.vector_store %arg7[%c0_20, %c0_21], %23 {strides = array<i32>} : memref<16x128xf32, #tpu.memory_space<vmem>>, vector<16x128xf32>,
    } else {
    }
    return
  }
  func.func @transform_0(%arg0: i32, %arg1: i32) -> (i32, i32) {
    %c0_i32 = arith.constant 0 : i32
    %c0_i32_0 = arith.constant 0 : i32
    return %arg0, %c0_i32 : i32, i32
  }
  func.func @transform_1(%arg0: i32, %arg1: i32) -> (i32, i32) {
    %c0_i32 = arith.constant 0 : i32
    %c0_i32_0 = arith.constant 0 : i32
    return %c0_i32, %arg1 : i32, i32
  }
  func.func @transform_2(%arg0: i32, %arg1: i32) -> (i32, i32) {
    %c0_i32 = arith.constant 0 : i32
    %c0_i32_0 = arith.constant 0 : i32
    return %c0_i32, %arg1 : i32, i32
  }
  func.func @transform_3(%arg0: i32, %arg1: i32) -> (i32, i32) {
    %c0_i32 = arith.constant 0 : i32
    %c0_i32_0 = arith.constant 0 : i32
    return %arg1, %c0_i32 : i32, i32
  }
  func.func @transform_4(%arg0: i32, %arg1: i32) -> (i32, i32) {
    %c0_i32 = arith.constant 0 : i32
    %c0_i32_0 = arith.constant 0 : i32
    %c0_i32_1 = arith.constant 0 : i32
    return %c0_i32, %c0_i32_0 : i32, i32
  }
  func.func @transform_5(%arg0: i32, %arg1: i32) -> (i32, i32) {
    %c0_i32 = arith.constant 0 : i32
    %c0_i32_0 = arith.constant 0 : i32
    return %arg0, %c0_i32 : i32, i32
  }
}

</mosaic_0001>

<bundles_post_ra>
// kernel: tpu_custom_call.1
= control target key start
LH: loop header
LB: loop body
LE: loop exit
PB: predicated region body
PF: predicated region fallthrough
CT: control target
= control target key end

     0   :  { %10 = vsyncpa [#allocation4], 0  ;;  %s690_s0 = inlined_call_operand.hbm [shape: bf16[16,128], index: 0, kind: input, shape index: {}]   ;;  %s691_s1 = inlined_call_operand.hbm [shape: bf16[128,64], index: 1, kind: input, shape index: {}]   ;;  %s692_s2 = inlined_call_operand.hbm [shape: f32[1,64], index: 2, kind: input, shape index: {}]   ;;  %s693_s3 = inlined_call_operand.hbm [shape: bf16[64,128], index: 3, kind: input, shape index: {}]   ;;  %s694_s4 = inlined_call_operand.hbm [shape: f32[1,128], index: 4, kind: input, shape index: {}]   ;;  %s695_s5 = inlined_call_operand.hbm [shape: f32[16,128], index: 5, kind: output, shape index: {}]  }
   0x1   :  { %11 = vsyncpa [#allocation7], 0 }
   0x2   :  { %12 = vsyncpa [#allocation10], 0 }
   0x3   :  { %13 = vsyncpa [#allocation5], 0  ;;  %s560_s18 = smov [#allocation6]   ;;  %s561_s20 = smov [#allocation9]  }
   0x4   :  { %s31_s19 = sshll.u32 %s560_s18, 4  ;;  %s53_s21 = sshll.u32 %s561_s20, 4  ;;  %s32_s19 = int_to_ptr.vmem [resolvable:$true] %s31_s19  ;;  %s602_s21 = int_to_ptr.vmem [resolvable:$true] %s53_s21 }
   0x5   :  { %s420_s24 = scalar_lea.hbm %s691_s1, 1024 }
   0x6   :  { %p421_p0 = scmp.ne.s32.totalorder %s691_s1, %s420_s24  ;;  %p424_p1 = scmp.lt.u32.totalorder %s420_s24, %s691_s1 }
   0x8   :  { %p426_p2 = pnand %p424_p1, %p421_p0 }
   0xa   :  { %429 = shalt.err (!%p426_p2)
}
   0xb   :  { %s430_s29 = scalar_lea.vmem %s32_s19, 1024  ;;  %p435_p4 = scmp.lt.s32.totalorder %s32_s19, %s32_s19 }
   0xc   :  { %p431_p3 = scmp.ne.s32.totalorder %s32_s19, %s430_s29  ;;  %p436_p5 = scmp.lt.s32.totalorder %s430_s29, %s430_s29 }
   0xe   :  { %p437_p6 = por %p436_p5, %p435_p4 }
  0x10   :  { %p438_p7 = pnand %p437_p6, %p431_p3 }
  0x12   :  { %441 = shalt.err (!%p438_p7)
}
  0x13   :  { %s562_s30 = smov 64   ;;  %s563_s6 = smov 4  }
  0x14   :  { %37 = dma.hbm_to_vmem [thread:$0]  %s691_s1, 1024, %s32_s19, [#allocation7], %s562_s30, %s562_s30, %s563_s6  }
  0x15   :  { %s442_s11 = scalar_lea.hbm %s693_s3, 512 }
  0x16   :  { %p443_p8 = scmp.ne.s32.totalorder %s693_s3, %s442_s11  ;;  %p446_p9 = scmp.lt.u32.totalorder %s442_s11, %s693_s3 }
  0x18   :  { %p448_p10 = pnand %p446_p9, %p443_p8 }
  0x1a   :  { %451 = shalt.err (!%p448_p10)
}
  0x1b   :  { %s452_s16 = scalar_lea.vmem %s602_s21, 512  ;;  %p457_p12 = scmp.lt.s32.totalorder %s602_s21, %s602_s21 }
  0x1c   :  { %p453_p11 = scmp.ne.s32.totalorder %s602_s21, %s452_s16  ;;  %p458_p13 = scmp.lt.s32.totalorder %s452_s16, %s452_s16 }
  0x1e   :  { %p459_p0 = por %p458_p13, %p457_p12 }
  0x20   :  { %p460_p1 = pnand %p459_p0, %p453_p11 }
  0x22   :  { %463 = shalt.err (!%p460_p1)
}
  0x23   :  { %59 = dma.hbm_to_vmem [thread:$0]  %s693_s3, 512, %s602_s21, [#allocation10], %s562_s30, %s562_s30, %s563_s6  }
  0x24   :  { %s564_s18 = smov [#allocation3]   ;;  %s565_s20 = smov [#allocation8]  }
  0x25   :  { %s19_s19 = sshll.u32 %s564_s18, 4  ;;  %s44_s22 = sshll.u32 %s565_s20, 4  ;;  %s20_s19 = int_to_ptr.vmem [resolvable:$true] %s19_s19  ;;  %s45_s22 = int_to_ptr.vmem [resolvable:$true] %s44_s22 }
  0x26   :  { %s464_s25 = scalar_lea.hbm %s690_s0, 128 }
  0x27   :  { %p465_p2 = scmp.ne.s32.totalorder %s690_s0, %s464_s25  ;;  %p468_p3 = scmp.lt.u32.totalorder %s464_s25, %s690_s0 }
  0x29   :  { %p470_p4 = pnand %p468_p3, %p465_p2 }
  0x2b   :  { %473 = shalt.err (!%p470_p4)
}
  0x2c   :  { %s474_s3 = scalar_lea.vmem %s20_s19, 128  ;;  %p479_p6 = scmp.lt.s32.totalorder %s20_s19, %s20_s19 }
  0x2d   :  { %p475_p5 = scmp.ne.s32.totalorder %s20_s19, %s474_s3  ;;  %p480_p7 = scmp.lt.s32.totalorder %s474_s3, %s474_s3 }
  0x2f   :  { %p481_p8 = por %p480_p7, %p479_p6 }
  0x31   :  { %p482_p9 = pnand %p481_p8, %p475_p5 }
  0x33   :  { %485 = shalt.err (!%p482_p9)
}
  0x34   :  { %25 = dma.hbm_to_vmem [thread:$0]  %s690_s0, 128, %s20_s19, [#allocation4], %s562_s30, %s562_s30, %s563_s6  }
  0x35   :  { %s486_s10 = scalar_lea.hbm %s692_s2, 16 }
  0x36   :  { %p487_p10 = scmp.ne.s32.totalorder %s692_s2, %s486_s10  ;;  %p490_p11 = scmp.lt.u32.totalorder %s486_s10, %s692_s2 }
  0x38   :  { %p492_p12 = pnand %p490_p11, %p487_p10 }
  0x3a   :  { %495 = shalt.err (!%p492_p12)
}
  0x3b   :  { %s496_s15 = scalar_lea.vmem %s45_s22, 16  ;;  %s500_s16 = scalar_lea.vmem %s45_s22, 32 }
  0x3c   :  { %p497_p13 = scmp.ne.s32.totalorder %s45_s22, %s496_s15  ;;  %p501_p0 = scmp.lt.s32.totalorder %s45_s22, %s45_s22 }
  0x3d   :  { %p502_p1 = scmp.lt.s32.totalorder %s500_s16, %s496_s15 }
  0x3f   :  { %p503_p2 = por %p502_p1, %p501_p0 }
  0x41   :  { %p504_p3 = pnand %p503_p2, %p497_p13 }
  0x43   :  { %507 = shalt.err (!%p504_p3)
}
  0x44   :  { %47 = dma.hbm_to_vmem [thread:$0]  %s692_s2, 16, %s45_s22, [#allocation7]  }
  0x45   :  { %s566_s6 = smov [#allocation11]   ;;  %s508_s19 = scalar_lea.hbm %s694_s4, 16 }
  0x46   :  { %s66_s1 = sshll.u32 %s566_s6, 4  ;;  %p509_p4 = scmp.ne.s32.totalorder %s694_s4, %s508_s19  ;;  %s67_s1 = int_to_ptr.vmem [resolvable:$true] %s66_s1 }
  0x47   :  { %p512_p5 = scmp.lt.u32.totalorder %s508_s19, %s694_s4 }
  0x49   :  { %p514_p6 = pnand %p512_p5, %p509_p4 }
  0x4b   :  { %517 = shalt.err (!%p514_p6)
}
  0x4c   :  { %s518_s26 = scalar_lea.vmem %s67_s1, 16  ;;  %s522_s2 = scalar_lea.vmem %s67_s1, 32 }
  0x4d   :  { %p519_p7 = scmp.ne.s32.totalorder %s67_s1, %s518_s26  ;;  %p523_p8 = scmp.lt.s32.totalorder %s67_s1, %s67_s1 }
  0x4e   :  { %p524_p9 = scmp.lt.s32.totalorder %s522_s2, %s518_s26 }
  0x50   :  { %p525_p10 = por %p524_p9, %p523_p8 }
  0x52   :  { %p526_p11 = pnand %p525_p10, %p519_p7 }
  0x54   :  { %529 = shalt.err (!%p526_p11)
}
  0x55   :  { %69 = dma.hbm_to_vmem [thread:$0]  %s694_s4, 16, %s67_s1, [#allocation10]  }
  0x56   :  { %552 = dma.done.wait [#allocation4], 128  }
  0x57   :  { %553 = vsyncadd [#allocation4], 4294967168 }
  0x58   :  { %554 = dma.done.wait [#allocation7], 1040  }
  0x59   :  { %555 = vsyncadd [#allocation7], 4294966256 }
  0x5a   :  { %556 = dma.done.wait [#allocation10], 528  }
  0x5b   :  { %557 = vsyncadd [#allocation10], 4294966768  ;;  %v567_v0 = vmov 0.0   ;;  %vm568_vm0 = vmmov 0   ;;  %v407_v1 = vld [vmem:[#allocation6] sm:$0xff]   ;;  %v408_v2 = vld [vmem:[#allocation6 + $0x8] sm:$0xff]  }
  0x5c   :  { %363 = vmatprep.subr.bf16.mxu0 %v567_v0  ;;  %379 = vmatprep.mubr.msk.bf16.mxu0 %vm568_vm0, %v567_v0  ;;  %v409_v3 = vld [vmem:[#allocation6 + $0x10] sm:$0xff]   ;;  %v416_v4 = vld [vmem:[#allocation9] sm:$0xff]   ;;  %v410_v5 = vld [vmem:[#allocation6 + $0x18] sm:$0xff]   ;;  %vm249_vm1 = vcmask 523264   ;;  %s569_s4 = smov [#allocation12]  }
  0x5d   :  { %383 = vmatprep.subr.bf16.mxu1 %v567_v0  ;;  %391 = vmatprep.mubr.msk.bf16.mxu1 %vm568_vm0, %v567_v0  ;;  %v417_v6 = vld [vmem:[#allocation9 + $0x8] sm:$0xff]   ;;  %v411_v7 = vld [vmem:[#allocation6 + $0x20] sm:$0xff]   ;;  %v414_v10 = vld [vmem:[#allocation6 + $0x38] sm:$0xff]   ;;  %s319_s28 = sshll.u32 %s569_s4, 4  ;;  %s320_s28 = int_to_ptr.vmem [resolvable:$true] %s319_s28 }
  0x5e   :  { %364 = vmatpush3.bf16.msra.mxu0 %v407_v1  ;;  %384 = vmatpush3.bf16.msra.mxu1 %v416_v4  ;;  %v412_v8 = vld [vmem:[#allocation6 + $0x28] sm:$0xff]   ;;  %v413_v9 = vld [vmem:[#allocation6 + $0x30] sm:$0xff]   ;;  %v415_v11 = vld [vmem:[#allocation3] sm:$0xff]   ;;  %s530_s29 = scalar_lea.vmem %s320_s28, 256  ;;  %p535_p13 = scmp.lt.s32.totalorder %s320_s28, %s320_s28 }
  0x5f   :  { %365 = vmatprep.subr.bf16.mxu0 %v567_v0  ;;  %385 = vmatprep.subr.bf16.mxu1 %v567_v0  ;;  %v418_v12 = vld [vmem:[#allocation9 + $0x10] sm:$0xff]   ;;  %v419_v13 = vld [vmem:[#allocation9 + $0x18] sm:$0xff]   ;;  %v348_v24 = vld [vmem:[#allocation11] ss:$0 sm:$0xff]  ;;  %p531_p12 = scmp.ne.s32.totalorder %s320_s28, %s530_s29  ;;  %p536_p0 = scmp.lt.s32.totalorder %s530_s29, %s530_s29 }
  0x60   :  { %v333_v14 = vld [vmem:[#allocation8] ss:$0 sm:$0xff] }
  0x61   :  { %p537_p1 = por %p536_p0, %p535_p13 }
  0x62   :  { %366 = vmatpush3.bf16.msra.mxu0 %v408_v2  ;;  %386 = vmatpush3.bf16.msra.mxu1 %v417_v6 }
  0x63   :  { %367 = vmatprep.subr.bf16.mxu0 %v567_v0  ;;  %387 = vmatprep.subr.bf16.mxu1 %v567_v0  ;;  %p538_p2 = pnand %p537_p1, %p531_p12 }
  0x66   :  { %368 = vmatpush3.bf16.msra.mxu0 %v409_v3  ;;  %388 = vmatpush3.bf16.msra.mxu1 %v418_v12 }
  0x67   :  { %369 = vmatprep.subr.bf16.mxu0 %v567_v0  ;;  %389 = vmatprep.subr.bf16.mxu1 %v567_v0 }
  0x6a   :  { %370 = vmatpush3.bf16.msra.mxu0 %v410_v5  ;;  %390 = vmatpush3.bf16.msra.mxu1 %v419_v13 }
  0x6b   :  { %371 = vmatprep.subr.bf16.mxu0 %v567_v0 }
  0x6e   :  { %372 = vmatpush3.bf16.msra.mxu0 %v411_v7 }
  0x6f   :  { %373 = vmatprep.subr.bf16.mxu0 %v567_v0 }
  0x72   :  { %374 = vmatpush3.bf16.msra.mxu0 %v412_v8 }
  0x73   :  { %375 = vmatprep.subr.bf16.mxu0 %v567_v0 }
  0x76   :  { %376 = vmatpush3.bf16.msra.mxu0 %v413_v9 }
  0x77   :  { %377 = vmatprep.subr.bf16.mxu0 %v567_v0 }
  0x7a   :  { %378 = vmatpush3.bf16.msra.mxu0 %v414_v10 }
  0x7d   :  { %380 = vmatmul.mubr.bf16.vlgmr.msra.gmra.mrb[0].mxu0 %v415_v11 }
 0x150   :  { %v205_v15 = vpop.f32.mrb[0].mxu0 }
 0x151   :  { %v206_v16 = vadd.f32 %v333_v14, %v205_v15  ;;  %v381_v17 = vpop.f32.mrb[1].mxu0 }
 0x152   :  { %v208_v18 = vpop.f32.mrb[2].mxu0 }
 0x153   :  { %v209_v19 = vadd.f32 %v333_v14, %v208_v18  ;;  %v382_v20 = vpop.f32.mrb[3].mxu0  ;;  %v212_v21 = vmax.f32 %v206_v16, 0.0 }
 0x155   :  { %v213_v22 = vmax.f32 %v209_v19, 0.0 }
 0x157   :  { %v216_v23 = vpack.c.bf16 %v213_v22, %v212_v21 }
 0x159   :  { %392 = vmatmul.mubr.msk.bf16.vlgmr.msra.gmra.mrb[0].mxu1 %vm249_vm1, %v216_v23 }
 0x22c   :  { %v287_v25 = vpop.f32.mrb[0].mxu1 }
 0x22d   :  { %v310_v26 = vadd.f32 %v348_v24, %v287_v25  ;;  %v393_v27 = vpop.f32.mrb[1].mxu1 }
 0x22e   :  { %v290_v28 = vpop.f32.mrb[2].mxu1 }
 0x22f   :  { %312 = vst [vmem:[#allocation12] sm:$0xff] %v310_v26  ;;  %v311_v29 = vadd.f32 %v348_v24, %v290_v28  ;;  %v394_v30 = vpop.f32.mrb[3].mxu1 }
 0x231   :  { %313 = vst [vmem:[#allocation12 + $0x8] sm:$0xff] %v311_v29 }
 0x232   :  { %541 = shalt.err (!%p538_p2)
}
 0x233   :  { %s542_s7 = scalar_lea.hbm %s695_s5, 256 }
 0x234   :  { %p543_p3 = scmp.ne.s32.totalorder %s695_s5, %s542_s7  ;;  %p546_p4 = scmp.lt.u32.totalorder %s542_s7, %s695_s5 }
 0x236   :  { %p548_p5 = pnand %p546_p4, %p543_p3 }
 0x238   :  { %551 = shalt.err (!%p548_p5)
}
 0x239   :  { %s570_s12 = smov 128   ;;  %s571_s13 = smov 8  }
 0x23a   :  { %325 = dma.vmem_to_hbm [thread:$0]  %s320_s28, 256, %s695_s5, [#allocation5], %s570_s12, %s570_s12, %s571_s13  }
 0x23b   :  { %558 = dma.done.wait [#allocation5], 256  }
 0x23c   :  { %559 = vsyncadd [#allocation5], 4294967040 }
 0x23d   :  { %329 = vsyncpa [#allocation4], 1 }
 0x23e   :  { %330 = vsyncpa [#allocation7], 1 }
 0x23f   :  { %331 = vsyncpa [#allocation10], 1 }
 0x240   :  { %332 = vsyncpa [#allocation5], 1 }

</bundles_post_ra>
